<compile_context>
chip_gen: v6e
topology: v6e:2x2x1
jax: 0.10.0
libtpu: 0.0.40
codegen_flags: <defaults>
</compile_context>

<pallas_src>
import jax
import jax.numpy as jnp
from jax.experimental import pallas as pl
from jax.experimental.pallas import tpu as pltpu


def _logreg_kernel(x_ref, w_ref, b_ref, o_ref):
    # x_ref: (TM, D) input tile, w_ref: (1, D) weight row, b_ref: (1,1) in SMEM.
    x = x_ref[...].astype(jnp.float32)           # upcast in-kernel (bf16 ok)
    w = w_ref[...].astype(jnp.float32)           # (1, D), broadcasts over rows
    # VPU multiply + XLU lane reduction instead of a 1-lane MXU matmul.
    logits = jnp.sum(x * w, axis=-1, keepdims=True) + b_ref[0, 0]
    o_ref[...] = jax.nn.sigmoid(logits).astype(o_ref.dtype)


def _round_up(n, m):
    return ((n + m - 1) // m) * m


def _choose_tm(b, d, itemsize):
    # Keep the double-buffered x tile (2 * TM * D * itemsize) within ~8 MiB so
    # it fits comfortably even under v7x's 64 MiB physical / 32 MiB scoped VMEM.
    budget = 8 * 1024 * 1024
    tm = budget // max(1, 2 * d * itemsize)
    tm = min(tm, 2048, _round_up(b, 8))
    tm = max(8, (tm // 8) * 8)
    return tm


def logistic_regression_forward(x, weight, bias, *, tm=None):
    """x: (B, D) f32/bf16; weight: (1, D) (PyTorch nn.Linear layout); bias: (1,).
    Returns (B, 1) f32, matching torch.sigmoid(nn.Linear(D, 1)(x))."""
    B, D = x.shape
    itemsize = jnp.dtype(x.dtype).itemsize
    if tm is None:
        tm = _choose_tm(B, D, itemsize)
    tm = max(8, (tm // 8) * 8)

    # Pad the batch to a multiple of the tile (masked rows are sliced off).
    B_pad = _round_up(B, tm)
    if B_pad != B:
        x = jnp.pad(x, ((0, B_pad - B), (0, 0)))

    w_row = weight.reshape(1, D).astype(jnp.float32)   # lane-dense weight row
    b_sc = bias.reshape(1, 1).astype(jnp.float32)      # scalar, lives in SMEM

    grid = (B_pad // tm,)

    out = pl.pallas_call(
        _logreg_kernel,
        out_shape=jax.ShapeDtypeStruct((B_pad, 1), jnp.float32),
        grid=grid,
        in_specs=[
            pl.BlockSpec((tm, D), lambda i: (i, 0)),                      # x tile
            pl.BlockSpec((1, D), lambda i: (0, 0)),                       # weight row
            pl.BlockSpec(memory_space=pltpu.MemorySpace.SMEM),            # bias scalar
        ],
        out_specs=pl.BlockSpec((tm, 1), lambda i: (i, 0)),
        compiler_params=pltpu.CompilerParams(
            dimension_semantics=("parallel",),        # megacore sharding on v7x
            vmem_limit_bytes=32 * 1024 * 1024,
        ),
    )(x, w_row, b_sc)

    return out[:B]


if __name__ == "__main__":
    key = jax.random.PRNGKey(0)
    kx, kw, kb = jax.random.split(key, 3)

    B, D = 8, 32  # batch, input_size
    x = jax.random.normal(kx, (B, D), dtype=jnp.float32)
    # Deterministic parameter init (mimics nn.Linear uniform(-1/sqrt(D), 1/sqrt(D)))
    bound = 1.0 / (D ** 0.5)
    weight = jax.random.uniform(kw, (1, D), minval=-bound, maxval=bound,
                                dtype=jnp.float32)
    bias = jax.random.uniform(kb, (1,), minval=-bound, maxval=bound,
                              dtype=jnp.float32)

    out = logistic_regression_forward(x, weight, bias)
    out = jax.block_until_ready(out)

    # Reference check in plain JAX
    ref = jax.nn.sigmoid(x @ weight.T + bias)
    assert out.shape == (B, 1)
    assert jnp.allclose(out, ref, atol=1e-5), "mismatch vs reference"

    # Also exercise a ragged / larger batch to validate tiling + padding path.
    B2 = 1000
    x2 = jax.random.normal(jax.random.PRNGKey(1), (B2, D), dtype=jnp.float32)
    out2 = jax.block_until_ready(logistic_regression_forward(x2, weight, bias))
    ref2 = jax.nn.sigmoid(x2 @ weight.T + bias)
    assert out2.shape == (B2, 1)
    assert jnp.allclose(out2, ref2, atol=1e-5), "mismatch vs reference (tiled)"

    print("KERNEL_OK")
</pallas_src>

<mosaic_0001>
module attributes {stable_mosaic.version = 11 : i64} {
  func.func @_logreg_kernel(%arg0: i32, %arg1: memref<8x32xf32, #tpu.memory_space<vmem>>, %arg2: memref<1x32xf32, #tpu.memory_space<vmem>>, %arg3: memref<1x1xf32, #tpu.memory_space<smem>>, %arg4: memref<8x1xf32, #tpu.memory_space<vmem>>) attributes {dimension_semantics = [#tpu.dimension_semantics<parallel>], iteration_bounds = array<i64: 1>, scalar_prefetch = 0 : i64, scratch_operands = 0 : i64, tpu.core_type = #tpu.core_type<tc>, window_params = [{transform_indices = @transform_0, window_bounds = array<i64: 8, 32>}, {pipeline_mode = #tpu.pipeline_mode<synchronous>, transform_indices = @transform_1, window_bounds = array<i64: 1, 32>}, {transform_indices = @transform_2, window_bounds = array<i64: 1, 1>}, {transform_indices = @transform_3, window_bounds = array<i64: 8, 1>}]} {
    %c0 = arith.constant 0 : index
    %c0_0 = arith.constant 0 : index
    %0 = vector.load %arg1[%c0, %c0_0] : memref<8x32xf32, #tpu.memory_space<vmem>>, vector<8x32xf32>
    %c0_1 = arith.constant 0 : index
    %c0_2 = arith.constant 0 : index
    %1 = vector.load %arg2[%c0_1, %c0_2] : memref<1x32xf32, #tpu.memory_space<vmem>>, vector<1x32xf32>
    %2 = vector.broadcast %1 : vector<1x32xf32> to vector<8x32xf32>
    %3 = arith.mulf %0, %2 : vector<8x32xf32>
    %cst = arith.constant dense<0.000000e+00> : vector<8xf32>
    %4 = vector.multi_reduction <add>, %3, %cst [1] : vector<8x32xf32> to vector<8xf32>
    %5 = vector.shape_cast %4 : vector<8xf32> to vector<8x1xf32>
    %c0_3 = arith.constant 0 : index
    %c0_4 = arith.constant 0 : index
    %6 = memref.load %arg3[%c0_3, %c0_4] : memref<1x1xf32, #tpu.memory_space<smem>>
    %7 = vector.broadcast %6 : f32 to vector<8x1xf32>
    %8 = arith.addf %5, %7 : vector<8x1xf32>
    %9 = arith.negf %8 : vector<8x1xf32>
    %10 = math.exp %9 : vector<8x1xf32>
    %cst_5 = arith.constant 1.000000e+00 : f32
    %11 = vector.broadcast %cst_5 : f32 to vector<8x1xf32>
    %12 = arith.addf %11, %10 : vector<8x1xf32>
    %13 = arith.divf %11, %12 : vector<8x1xf32>
    %c0_6 = arith.constant 0 : index
    %c0_7 = arith.constant 0 : index
    %14 = vector.load %arg4[%c0_6, %c0_7] : memref<8x1xf32, #tpu.memory_space<vmem>>, vector<8x1xf32>
    tpu.vector_store %arg4[%c0_6, %c0_7], %13 {strides = array<i32>} : memref<8x1xf32, #tpu.memory_space<vmem>>, vector<8x1xf32>,
    return
  }
  func.func @transform_0(%arg0: i32) -> (i32, i32) {
    %c0_i32 = arith.constant 0 : i32
    %c0_i32_0 = arith.constant 0 : i32
    return %arg0, %c0_i32 : i32, i32
  }
  func.func @transform_1(%arg0: i32) -> (i32, i32) {
    %c0_i32 = arith.constant 0 : i32
    %c0_i32_0 = arith.constant 0 : i32
    %c0_i32_1 = arith.constant 0 : i32
    return %c0_i32, %c0_i32_0 : i32, i32
  }
  func.func @transform_2(%arg0: i32) -> (i32, i32) {
    %c0_i32 = arith.constant 0 : i32
    %c0_i32_0 = arith.constant 0 : i32
    %c0_i32_1 = arith.constant 0 : i32
    return %c0_i32, %c0_i32_0 : i32, i32
  }
  func.func @transform_3(%arg0: i32) -> (i32, i32) {
    %c0_i32 = arith.constant 0 : i32
    %c0_i32_0 = arith.constant 0 : i32
    return %arg0, %c0_i32 : i32, i32
  }
}

</mosaic_0001>

<bundles_post_ra>
// kernel: tpu_custom_call.1
= control target key start
LH: loop header
LB: loop body
LE: loop exit
PB: predicated region body
PF: predicated region fallthrough
CT: control target
= control target key end

     0   :  { %9 = vsyncpa [#allocation4], 0  ;;  %s85_s12 = smov [#allocation3]   ;;  %s118_s0 = inlined_call_operand.hbm [shape: f32[8,32], index: 0, kind: input, shape index: {}]   ;;  %s119_s1 = inlined_call_operand.vmem [shape: f32[1,32], index: 1, kind: input, shape index: {}]   ;;  %s120_s2 = inlined_call_operand.<no memory space> [shape: f32[1,1], index: 2, kind: input, shape index: {}]   ;;  %s121_s3 = inlined_call_operand.vmem [shape: f32[8,1], index: 3, kind: output, shape index: {}]  }
   0x1   :  { %s16_s13 = sshll.u32 %s85_s12, 4  ;;  %s17_s13 = int_to_ptr.vmem [resolvable:$true] %s16_s13 }
   0x2   :  { %s71_s14 = scalar_lea.vmem %s17_s13, 128  ;;  %p76_p1 = scmp.lt.s32.totalorder %s17_s13, %s17_s13 }
   0x3   :  { %p72_p0 = scmp.ne.s32.totalorder %s17_s13, %s71_s14  ;;  %p77_p2 = scmp.lt.s32.totalorder %s71_s14, %s71_s14 }
   0x5   :  { %p78_p3 = por %p77_p2, %p76_p1 }
   0x7   :  { %p79_p4 = pnand %p78_p3, %p72_p0 }
   0x9   :  { %82 = shalt.err (!%p79_p4)
}
   0xa   :  { %19 = dma.hbm_to_vmem [thread:$0]  %s118_s0, 128, %s17_s13, [#allocation4]  }
   0xb   :  { %83 = dma.done.wait [#allocation4], 128  }
   0xc   :  { %84 = vsyncadd [#allocation4], 4294967168  ;;  %v27_v0 = vld [vmem:[#allocation3] sm:$0xff]  ;;  %vm36_vm0 = vcmask 261120   ;;  %v41_v4 = vstv %s120_s2  ;;  %vm49_vm1 = vcmask 7168  }
   0xd   :  { %v56_v1 = vld [vmem:[%s119_s1] ss:$0 sm:$0xff] }
   0xe   :  { %v35_v2 = vmul.f32 %v56_v1, %v27_v0 }
  0x10   :  { %v37_v3 = vsel %vm36_vm0, %v35_v2, 0.0 }
  0x11   :  { %38 = vadd.xlane.f32.xlu0 %v37_v3 }
  0x9a   :  { %v39_v5 = vpop.xlane.xlu0 %38 }
  0x9b   :  { %v42_v6 = vadd.f32 %v41_v4, %v39_v5 }
  0x9d   :  { %v57_v7 = vmul.f32 -1.442695, %v42_v6 }
  0x9f   :  { %59 = vpow2.f32 %v57_v7 }
  0xac   :  { %v60_v8 = vpop.eup %59 }
  0xad   :  { %v46_v9 = vadd.f32 1.0, %v60_v8 }
  0xaf   :  { %61 = vrcp.f32 %v46_v9 }
  0xbc   :  { %v62_v10 = vpop.eup %61 }
  0xbd   :  { %50 = vst.msk [vmem:[%s121_s3] sm:$0xff] %vm49_vm1, %v62_v10 }
  0xbe   :  { %55 = vsyncpa [#allocation4], 1 }

</bundles_post_ra>
